<compile_context>
chip_gen: v7x
topology: tpu7x:2x2x1
jax: 0.10.0
libtpu: 0.0.40
codegen_flags: <defaults>
</compile_context>

<pallas_src>
import functools

import jax
import jax.numpy as jnp
from jax import lax
from jax.experimental import pallas as pl
from jax.experimental.pallas import tpu as pltpu


def _round_up(x: int, m: int) -> int:
    return ((x + m - 1) // m) * m


def _cdiv(a: int, b: int) -> int:
    return (a + b - 1) // b


def _vmem_capacity_bytes() -> int:
    """Per-core VMEM capacity; conservative fallback if the query is unavailable."""
    try:
        return int(pltpu.get_tpu_info().vmem_capacity_bytes)
    except Exception:
        return 64 * 1024 * 1024  # v7x per-TensorCore size (most restrictive)


def _rmsnorm2d_kernel(x_ref, g_ref, o_ref, *, eps: float, hw: int):
    # x_ref: (tile_rows, HW)   activation row tile
    # g_ref: (tile_rows, 1)    per-row gain tile (f32)
    # o_ref: (tile_rows, HW)
    #
    # Pass 1: mean of squares over the spatial (lane) axis. The f32 upcast here
    # is NOT reused below, so its live range ends at the reduce.
    x32 = x_ref[...].astype(jnp.float32)
    ms = jnp.sum(x32 * x32, axis=-1, keepdims=True) * (1.0 / hw)

    # 1 / max(sqrt(ms), eps) == rsqrt(max(ms, eps^2))  (valid since eps > 0).
    # (tile_rows, 1) column only; rsqrt goes to the EUP slot.
    inv = lax.rsqrt(jnp.maximum(ms, jnp.float32(eps) * jnp.float32(eps)))

    # Fuse the per-row gain into the scale -> one full-width multiply total.
    scale = inv * g_ref[...]

    # Pass 2: re-read x_ref (cheap: 3 vld slots/cycle, op is HBM-bound) so no
    # block-sized f32 temporary stays live across both uses.
    o_ref[...] = (x_ref[...].astype(jnp.float32) * scale).astype(o_ref.dtype)


def _pick_tile_rows(nc: int, hw: int, itemsize: int, vmem_cap: int) -> int:
    """Row-tile size: big enough to amortize grid-step overhead, small enough
    to fit the pipelined footprint in this generation's VMEM."""
    sub = max(8, 32 // itemsize)           # min sublane tile: 8 f32 / 16 bf16 / 32 int8
    hw_lanes = _round_up(hw, 128)          # VMEM lane padding of the last dim
    row_bytes = hw_lanes * itemsize

    big_vmem = vmem_cap >= 96 * 1024 * 1024
    block_budget = (8 if big_vmem else 4) * 1024 * 1024   # v5e/v6e : v7x

    tr = (block_budget // row_bytes // sub) * sub
    nc_rounded = _round_up(nc, sub)

    if tr < sub:
        # Huge H*W: even `sub` rows overflow the normal block budget. Allow a
        # bigger block while the pipelined footprint clearly fits VMEM.
        if sub * row_bytes <= vmem_cap // 10:
            tr = sub
        else:
            # TODO(synk): split H*W onto a second ("arbitrary") grid axis with a
            # per-row sum-of-squares accumulator in VMEM scratch (two passes).
            raise ValueError(
                f"RMSNorm2d Pallas kernel: H*W={hw} is too large for a "
                f"single-row VMEM block on this chip (VMEM={vmem_cap} bytes)."
            )

    # Megacore (v7x has 2 TensorCores): cap at ~half the rows so the grid has
    # >= 2 steps and the 'parallel' axis can actually be sharded.
    half = max(sub, _round_up(_cdiv(nc_rounded, 2), sub))
    tr = min(tr, half)

    # Bound the lane-padded (rows, 1) gain block (~512 B/row): past a few
    # thousand rows per block there is no bandwidth benefit, only VMEM cost.
    tr = min(tr, 4096)
    return max(tr, sub)


def rmsnorm2d(x: jax.Array, g: jax.Array, eps: float = 1e-8) -> jax.Array:
    """x: (N, C, H, W) NCHW, g: (1, C, 1, 1). Returns (N, C, H, W)."""
    N, C, H, W = x.shape
    HW = H * W
    NC = N * C

    itemsize = jnp.dtype(x.dtype).itemsize
    vmem_cap = _vmem_capacity_bytes()
    tile_rows = _pick_tile_rows(NC, HW, itemsize, vmem_cap)
    grid_rows = _cdiv(NC, tile_rows)

    # ---- cheap glue (free reshapes; nothing is padded) ----
    x2 = x.reshape(NC, HW)                                        # no copy
    g_rows = jnp.broadcast_to(g.reshape(1, C), (N, C)).reshape(NC, 1)
    g_rows = g_rows.astype(jnp.float32)

    # Scoped-VMEM limit from the actual pipelined footprint:
    #   2 bufs x (x-in + out) blocks + transient f32 square temp
    #   + 2 bufs of the lane-padded gain tile + headroom.
    hw_lanes = _round_up(HW, 128)
    block_bytes = tile_rows * hw_lanes * itemsize
    f32_temp_bytes = tile_rows * hw_lanes * 4
    gain_bytes = tile_rows * 128 * 4
    footprint = 4 * block_bytes + f32_temp_bytes + 2 * gain_bytes + (4 << 20)
    vmem_limit = int(min(vmem_cap * 3 // 4, max(32 << 20, footprint)))

    kernel = functools.partial(_rmsnorm2d_kernel, eps=eps, hw=HW)

    out = pl.pallas_call(
        kernel,
        out_shape=jax.ShapeDtypeStruct((NC, HW), x.dtype),
        grid_spec=pltpu.PrefetchScalarGridSpec(
            num_scalar_prefetch=0,
            grid=(grid_rows,),
            in_specs=[
                # activation row tile (ragged last block handled by Pallas)
                pl.BlockSpec((tile_rows, HW), lambda i: (i, 0)),
                # per-row gain tile: tiny per-step DMA, hidden under the big one
                pl.BlockSpec((tile_rows, 1), lambda i: (i, 0)),
            ],
            out_specs=pl.BlockSpec((tile_rows, HW), lambda i: (i, 0)),
        ),
        compiler_params=pltpu.CompilerParams(
            dimension_semantics=("parallel",),
            vmem_limit_bytes=vmem_limit,
        ),
        cost_estimate=pl.CostEstimate(
            flops=3 * NC * HW,            # square + reduce + scale
            transcendentals=NC,           # one rsqrt per row
            bytes_accessed=2 * NC * HW * itemsize + 4 * NC,
        ),
    )(x2, g_rows)

    return out.reshape(N, C, H, W)


def rmsnorm2d_ref(x, g, eps=1e-8):
    # pure-JAX reference mirroring the PyTorch forward
    norm = jnp.sqrt(jnp.sum(x * x, axis=(2, 3), keepdims=True))
    norm = norm / jnp.sqrt(jnp.float32(x.shape[2] * x.shape[3])).astype(x.dtype)
    return x / jnp.maximum(norm, eps) * g


if __name__ == "__main__":
    key = jax.random.PRNGKey(0)
    N, C, H, W = 2, 4, 16, 16

    x = jax.random.normal(key, (N, C, H, W), dtype=jnp.float32)
    # deterministic parameter init: nn.Parameter(torch.ones(1, C, 1, 1))
    g = jnp.ones((1, C, 1, 1), dtype=jnp.float32)

    out = rmsnorm2d(x, g, eps=1e-8)
    out = jax.block_until_ready(out)

    ref = rmsnorm2d_ref(x, g, eps=1e-8)
    assert out.shape == (N, C, H, W)
    assert jnp.allclose(out, ref, atol=1e-5, rtol=1e-5), "mismatch vs reference"

    print("KERNEL_OK")
</pallas_src>

<mosaic_0001>
module attributes {stable_mosaic.version = 11 : i64} {
  func.func @_rmsnorm2d_kernel(%arg0: i32, %arg1: memref<8x256xf32, #tpu.memory_space<vmem>>, %arg2: memref<8x1xf32, #tpu.memory_space<vmem>>, %arg3: memref<8x256xf32, #tpu.memory_space<vmem>>) attributes {dimension_semantics = [#tpu.dimension_semantics<parallel>], iteration_bounds = array<i64: 1>, scalar_prefetch = 0 : i64, scratch_operands = 0 : i64, tpu.core_type = #tpu.core_type<tc>, window_params = [{transform_indices = @transform_0, window_bounds = array<i64: 8, 256>}, {transform_indices = @transform_1, window_bounds = array<i64: 8, 1>}, {transform_indices = @transform_2, window_bounds = array<i64: 8, 256>}]} {
    %c0 = arith.constant 0 : index
    %c0_0 = arith.constant 0 : index
    %0 = vector.load %arg1[%c0, %c0_0] : memref<8x256xf32, #tpu.memory_space<vmem>>, vector<8x256xf32>
    %1 = arith.mulf %0, %0 : vector<8x256xf32>
    %cst = arith.constant dense<0.000000e+00> : vector<8xf32>
    %2 = vector.multi_reduction <add>, %1, %cst [1] : vector<8x256xf32> to vector<8xf32>
    %3 = vector.shape_cast %2 : vector<8xf32> to vector<8x1xf32>
    %cst_1 = arith.constant 3.906250e-03 : f32
    %4 = vector.broadcast %cst_1 : f32 to vector<8x1xf32>
    %5 = arith.mulf %3, %4 : vector<8x1xf32>
    %cst_2 = arith.constant 9.99999993E-9 : f32
    %cst_3 = arith.constant 9.99999993E-9 : f32
    %6 = arith.mulf %cst_2, %cst_3 : f32
    %7 = vector.broadcast %6 : f32 to vector<8x1xf32>
    %8 = arith.maximumf %5, %7 : vector<8x1xf32>
    %9 = math.rsqrt %8 : vector<8x1xf32>
    %c0_4 = arith.constant 0 : index
    %c0_5 = arith.constant 0 : index
    %10 = vector.load %arg2[%c0_4, %c0_5] : memref<8x1xf32, #tpu.memory_space<vmem>>, vector<8x1xf32>
    %11 = arith.mulf %9, %10 : vector<8x1xf32>
    %c0_6 = arith.constant 0 : index
    %c0_7 = arith.constant 0 : index
    %12 = vector.load %arg1[%c0_6, %c0_7] : memref<8x256xf32, #tpu.memory_space<vmem>>, vector<8x256xf32>
    %13 = vector.broadcast %11 : vector<8x1xf32> to vector<8x256xf32>
    %14 = arith.mulf %12, %13 : vector<8x256xf32>
    %c0_8 = arith.constant 0 : index
    %c0_9 = arith.constant 0 : index
    %15 = vector.load %arg3[%c0_8, %c0_9] : memref<8x256xf32, #tpu.memory_space<vmem>>, vector<8x256xf32>
    tpu.vector_store %arg3[%c0_8, %c0_9], %14 {strides = array<i32>} : memref<8x256xf32, #tpu.memory_space<vmem>>, vector<8x256xf32>,
    return
  }
  func.func @transform_0(%arg0: i32) -> (i32, i32) {
    %c0_i32 = arith.constant 0 : i32
    %c0_i32_0 = arith.constant 0 : i32
    return %arg0, %c0_i32 : i32, i32
  }
  func.func @transform_1(%arg0: i32) -> (i32, i32) {
    %c0_i32 = arith.constant 0 : i32
    %c0_i32_0 = arith.constant 0 : i32
    return %arg0, %c0_i32 : i32, i32
  }
  func.func @transform_2(%arg0: i32) -> (i32, i32) {
    %c0_i32 = arith.constant 0 : i32
    %c0_i32_0 = arith.constant 0 : i32
    return %arg0, %c0_i32 : i32, i32
  }
}

</mosaic_0001>

<bundles_post_ra>
// kernel: tpu_custom_call.1
= control target key start
LH: loop header
LB: loop body
LE: loop exit
PB: predicated region body
PF: predicated region fallthrough
CT: control target
= control target key end

     0   :  { %7 = vsyncpa [#allocation3], 0  ;;  %s159_s0 = inlined_call_operand.hbm [shape: f32[8,256], index: 0, kind: input, shape index: {}]   ;;  %s160_s1 = inlined_call_operand.vmem [shape: f32[8,1], index: 1, kind: input, shape index: {}]   ;;  %s161_s2 = inlined_call_operand.hbm [shape: f32[8,256], index: 2, kind: output, shape index: {}]  }
   0x1   :  { %8 = vsyncpa [#allocation4], 0  ;;  %s114_s9 = smov [#allocation2]   ;;  %s66_s13 = scalar_lea.hbm %s159_s0, 256 }
   0x2   :  { %s15_s10 = sshll.u32 %s114_s9, 4  ;;  %p67_p0 = scmp.ne.s32.totalorder %s159_s0, %s66_s13  ;;  %s16_s10 = int_to_ptr.vmem [resolvable:$true] %s15_s10 }
   0x3   :  { %p70_p1 = scmp.lt.u32.totalorder %s66_s13, %s159_s0 }
   0x5   :  { %p72_p2 = pnand %p70_p1, %p67_p0 }
   0x7   :  { %75 = shalt.err (!%p72_p2)
}
   0x8   :  { %s76_s18 = scalar_lea.vmem %s16_s10, 256  ;;  %p81_p4 = scmp.lt.s32.totalorder %s16_s10, %s16_s10 }
   0x9   :  { %p77_p3 = scmp.ne.s32.totalorder %s16_s10, %s76_s18  ;;  %p82_p5 = scmp.lt.s32.totalorder %s76_s18, %s76_s18 }
   0xb   :  { %p83_p6 = por %p82_p5, %p81_p4 }
   0xd   :  { %p84_p7 = pnand %p83_p6, %p77_p3 }
   0xf   :  { %87 = shalt.err (!%p84_p7)
}
  0x10   :  { %18 = dma.hbm_to_vmem [thread:$0]  %s159_s0, 256, %s16_s10, [#allocation3]  }
  0x11   :  { %110 = dma.done.wait [#allocation3], 256  }
  0x12   :  { %111 = vsyncadd [#allocation3], 4294967040  ;;  %v24_v0 = vld [vmem:[#allocation2] sm:$0xff]  ;;  %v25_v1 = vld [vmem:[#allocation2 + $0x8] sm:$0xff]  ;;  %v115_v5 = vmov 0   ;;  %s116_s0 = smov [#allocation5]  }
  0x13   :  { %v26_v2 = vmul.f32 %v24_v0, %v24_v0  ;;  %v27_v3 = vmul.f32 %v25_v1, %v25_v1  ;;  %63 = vset.pattern.permute.xlu0 %v115_v5  ;;  %v34_v9 = vld [vmem:[%s160_s1] sm:$0xff]  ;;  %s51_s23 = sshll.u32 %s116_s0, 4  ;;  %s52_s23 = int_to_ptr.vmem [resolvable:$true] %s51_s23 }
  0x14   :  { %s88_s24 = scalar_lea.vmem %s52_s23, 256  ;;  %p93_p9 = scmp.lt.s32.totalorder %s52_s23, %s52_s23 }
  0x15   :  { %v28_v4 = vadd.f32 %v27_v3, %v26_v2  ;;  %p89_p8 = scmp.ne.s32.totalorder %s52_s23, %s88_s24  ;;  %p94_p10 = scmp.lt.s32.totalorder %s88_s24, %s88_s24 }
  0x17   :  { %29 = vadd.xlane.f32.xlu0 %v28_v4  ;;  %p95_p11 = por %p94_p10, %p93_p9 }
  0x19   :  { %p96_p12 = pnand %p95_p11, %p89_p8 }
  0xa4   :  { %v30_v6 = vpop.xlane.xlu0 %29 }
  0xa5   :  { %v31_v7 = vmul.f32 0.00390625, %v30_v6 }
  0xa7   :  { %v32_v8 = vmax.f32 %v31_v7, 1e-16 }
  0xa9   :  { %64 = vrsqrt.f32 %v32_v8 }
  0xb3   :  { %v65_v10 = vpop.eup %64 }
  0xb4   :  { %v35_v11 = vmul.f32 %v65_v10, %v34_v9 }
  0xb6   :  { %38 = vperm.xlu0 %63, %v35_v11  }
 0x135   :  { %v39_v12 = vpop.permute.xlu0 %38 }
 0x136   :  { %v41_v13 = vmul.f32 %v39_v12, %v24_v0  ;;  %v42_v14 = vmul.f32 %v39_v12, %v25_v1 }
 0x138   :  { %43 = vst [vmem:[#allocation5] sm:$0xff] %v41_v13  ;;  %44 = vst [vmem:[#allocation5 + $0x8] sm:$0xff] %v42_v14 }
 0x139   :  { %99 = shalt.err (!%p96_p12)
}
 0x13a   :  { %s100_s26 = scalar_lea.hbm %s161_s2, 256 }
 0x13b   :  { %p101_p13 = scmp.ne.s32.totalorder %s161_s2, %s100_s26  ;;  %p104_p0 = scmp.lt.u32.totalorder %s100_s26, %s161_s2 }
 0x13d   :  { %p106_p1 = pnand %p104_p0, %p101_p13 }
 0x13f   :  { %109 = shalt.err (!%p106_p1)
}
 0x140   :  { %54 = dma.vmem_to_hbm [thread:$0]  %s52_s23, 256, %s161_s2, [#allocation4]  }
 0x141   :  { %112 = dma.done.wait [#allocation4], 256  }
 0x142   :  { %113 = vsyncadd [#allocation4], 4294967040 }
 0x143   :  { %58 = vsyncpa [#allocation3], 1 }
 0x144   :  { %59 = vsyncpa [#allocation4], 1 }

</bundles_post_ra>
